<compile_context>
chip_gen: v5e
topology: v5e:2x2
jax: 0.10.0
libtpu: 0.0.40
codegen_flags: <defaults>
</compile_context>

<pallas_src>
import functools

import jax
import jax.numpy as jnp
from jax import lax
from jax.experimental import pallas as pl
from jax.experimental.pallas import tpu as pltpu


# ---------------------------------------------------------------------------
# chip introspection helpers
# ---------------------------------------------------------------------------
def _device_kind():
    try:
        return jax.devices()[0].device_kind.lower()
    except Exception:
        return ""


def _tpu_vmem_bytes():
    try:
        return int(pltpu.get_tpu_info().vmem_capacity_bytes)
    except Exception:
        pass
    return (64 << 20) if "v7" in _device_kind() else (128 << 20)


def _is_v7():
    return "v7" in _device_kind()


def _bf16_eup():
    # v6e / v7x have bf16 EUP throughput; v2-v5 compute transcendentals in f32.
    k = _device_kind()
    return not any(v in k for v in ("v2", "v3", "v4", "v5"))


# ---------------------------------------------------------------------------
# squeeze(2) fused with tokenization:
#   NCHW (B, C, H, W) -> (B, 4C, N) with N = (H/2)*(W/2).
# The (B, 4C, N) token tensor is the flattened NCHW squeezed map, so the
# kernel output only needs a reshape on the way out.
# TODO(synk): fuse this 2x2 squeeze into the kernel (strided DMA of the four
# spatial phases); kept as one wrapper-side XLA transpose to keep the Mosaic
# lowering simple/robust.
# ---------------------------------------------------------------------------
def squeeze2_tokens(x):
    B, C, H, W = x.shape
    x = x.reshape(B, C, H // 2, 2, W // 2, 2)        # (B, C, Hb, 2, Wb, 2)
    x = jnp.transpose(x, (0, 3, 5, 1, 2, 4))         # (B, 2, 2, C, Hb, Wb)
    return x.reshape(B, 4 * C, (H // 2) * (W // 2))  # (B, 4C, N)


# ---------------------------------------------------------------------------
# tile-size selection (VMEM-derived)
# ---------------------------------------------------------------------------
def _largest_divisor_leq(n, cap):
    cap = max(1, min(n, cap))
    for d in range(cap, 0, -1):
        if n % d == 0:
            return d
    return 1


def _token_tile(n, cap):
    """Largest tile of the token axis that divides n and satisfies the
    (8,128) lane constraint (multiple of 128, or the full axis)."""
    if n <= cap:
        return n
    t = (cap // 128) * 128
    while t >= 128:
        if n % t == 0:
            return t
        t -= 128
    return n   # no 128-multiple divisor: fall back to the full axis


def _vmem_step_bytes(bb, caug, tq, tm):
    toks = 2 * bb * caug * (tq + tm) * 4      # double-buffered q/kv input tiles (f32)
    outb = 2 * bb * (caug - 1) * tq * 4       # double-buffered output tile
    scr = bb * (16 + 8) * tq * 4              # acc (13->16 sublanes) + running max
    score = bb * tm * tq * (4 + 2)            # f32 logits + bf16 exp copy
    casts = bb * caug * (tq + tm) * 2         # bf16 copies of the MXU operands
    return toks + outb + scr + score + casts


# ---------------------------------------------------------------------------
# Pallas kernel: gaussian non-local attention + residual, online softmax over
# the key/context axis (grid axis 2), deferred normalization via a ones-row.
# ---------------------------------------------------------------------------
def _gaussian_attention_kernel(gamma_ref, xq_ref, xkv_ref, o_ref,
                               m_sc, acc_sc, *, c_out, bf16_exp):
    mi = pl.program_id(2)

    @pl.when(mi == 0)
    def _():
        m_sc[...] = jnp.full_like(m_sc, -jnp.inf)
        acc_sc[...] = jnp.zeros_like(acc_sc)

    xq = xq_ref[...]                         # (BB, C+1, tq) f32, row C == 1.0
    xkv = xkv_ref[...]                       # (BB, C+1, tm) f32, row C == 1.0
    xq_b = xq.astype(jnp.bfloat16)
    xkv_b = xkv.astype(jnp.bfloat16)

    # s[b, m, q] = sum_c xkv[b, c, m] * xq[b, c, q]
    # (the appended ones-row adds a constant +1 to every logit, which cancels
    #  exactly under the max-subtracted softmax)
    s = lax.dot_general(
        xkv_b, xq_b,
        dimension_numbers=(((1,), (1,)), ((0,), (0,))),
        preferred_element_type=jnp.float32)                  # (BB, tm, tq)

    m_prev = m_sc[...]                                       # (BB, 1, tq)
    m_new = jnp.maximum(m_prev, jnp.max(s, axis=1, keepdims=True))
    alpha = jnp.exp(m_prev - m_new)                          # (BB, 1, tq)

    if bf16_exp:
        p_b = jnp.exp((s - m_new).astype(jnp.bfloat16))      # bf16 EUP (v6e/v7x)
    else:
        p_b = jnp.exp(s - m_new).astype(jnp.bfloat16)        # f32 EUP (v5e)

    # acc[b, c, q] = alpha*acc + sum_m xkv_aug[b, c, m] * exp(s - m)[b, m, q]
    # row c == c_out accumulates the softmax denominator (ones-row trick).
    pv = lax.dot_general(
        xkv_b, p_b,
        dimension_numbers=(((2,), (1,)), ((0,), (0,))),
        preferred_element_type=jnp.float32)                  # (BB, C+1, tq)
    acc_sc[...] = alpha * acc_sc[...] + pv
    m_sc[...] = m_new

    @pl.when(mi == pl.num_programs(2) - 1)
    def _():
        gamma = gamma_ref[0]
        acc = acc_sc[...]
        y = acc[:, :c_out, :]                                # unnormalized P @ X
        denom = acc[:, c_out:c_out + 1, :]                   # softmax row sums
        inv = pl.reciprocal(denom, approx=True)              # EUP slot
        # TODO(synk): for tiny N (<128) this store is lane-masked; folding two
        # batch elements into the lane axis would need a separate store path.
        o_ref[...] = (xq[:, :c_out, :] + gamma * (y * inv)).astype(o_ref.dtype)


def inv_attention_gaussian(tokens, gamma):
    """tokens: (B, C, N) channels-major.  Returns (B, C, N), same layout."""
    B, C, N = tokens.shape
    caug = C + 1

    # ones-row for deferred softmax normalization (free: C=12 pads to 16
    # bf16 sublanes anyway).
    aug = jnp.concatenate(
        [tokens, jnp.ones((B, 1, N), tokens.dtype)], axis=1)       # (B, C+1, N)

    # --- VMEM-derived tiling ------------------------------------------------
    vmem_cap = _tpu_vmem_bytes()
    vmem_limit = min(int(0.65 * vmem_cap), 96 * 1024 * 1024)
    budget = int(0.8 * vmem_limit)

    t_cap = 256 if _is_v7() else 512          # token tile for query & key axes
    tq = _token_tile(N, t_cap)
    tm = tq

    bb = _largest_divisor_leq(B, B)
    while bb > 1 and _vmem_step_bytes(bb, caug, tq, tm) > budget:
        bb = _largest_divisor_leq(B, bb - 1)
    # v7x has two TensorCores: keep >=2 parallel grid steps when possible.
    if _is_v7() and bb == B and B % 2 == 0:
        bb = B // 2

    assert B % bb == 0 and N % tq == 0 and N % tm == 0
    grid = (B // bb, N // tq, N // tm)

    gamma_arr = jnp.asarray([gamma], dtype=jnp.float32)

    kernel = functools.partial(
        _gaussian_attention_kernel, c_out=C, bf16_exp=_bf16_eup())

    return pl.pallas_call(
        kernel,
        out_shape=jax.ShapeDtypeStruct((B, C, N), tokens.dtype),
        grid=grid,
        in_specs=[
            pl.BlockSpec(memory_space=pltpu.MemorySpace.SMEM),            # gamma
            pl.BlockSpec((bb, caug, tq), lambda b, qi, mi: (b, 0, qi)),   # queries
            pl.BlockSpec((bb, caug, tm), lambda b, qi, mi: (b, 0, mi)),   # keys/values
        ],
        out_specs=pl.BlockSpec((bb, C, tq), lambda b, qi, mi: (b, 0, qi)),
        scratch_shapes=[
            pltpu.VMEM((bb, 1, tq), jnp.float32),       # running max
            pltpu.VMEM((bb, caug, tq), jnp.float32),    # running (P@X | denom)
        ],
        compiler_params=pltpu.CompilerParams(
            dimension_semantics=("parallel", "parallel", "arbitrary"),
            vmem_limit_bytes=vmem_limit),
    )(gamma_arr, aug, aug)


class AttentionTestGaussian:
    """JAX/Pallas port of Attention_TestGaussian (forward path only)."""

    def __init__(self, gamma=0.1):
        # TODO(synk): exact gamma parameterization of InvAttention_gaussian
        # (learned / Lipschitz-normalized gamma, convGamma branch) is not in
        # the prompt; gamma is a runtime scalar here (convGamma=False case).
        self.gamma = float(gamma)

    def __call__(self, x):
        B, C, H, W = x.shape
        tokens = squeeze2_tokens(x)                          # (B, 4C, N)
        out = inv_attention_gaussian(tokens, self.gamma)     # (B, 4C, N)
        # tokens are already the flattened NCHW squeezed map -> reshape only
        return out.reshape(B, 4 * C, H // 2, W // 2)


# ---------------------------------------------------------------------------
# pure-JAX reference for a tolerance check
# ---------------------------------------------------------------------------
def _reference(x, gamma):
    tokens = squeeze2_tokens(x).astype(jnp.float32)
    s = jnp.einsum('bcn,bcm->bnm', tokens, tokens,
                   precision=lax.Precision.HIGHEST)
    p = jax.nn.softmax(s, axis=-1)
    y = jnp.einsum('bnm,bcm->bcn', p, tokens,
                   precision=lax.Precision.HIGHEST)
    out = tokens + gamma * y
    B, C, H, W = x.shape
    return out.reshape(B, 4 * C, H // 2, W // 2)


if __name__ == "__main__":
    key = jax.random.PRNGKey(0)
    # 3 input channels so squeeze(2) yields 12 channels (InvAttention_gaussian(12))
    x = jax.random.normal(key, (2, 3, 16, 16), dtype=jnp.float32)

    model = AttentionTestGaussian(gamma=0.1)
    fwd = jax.jit(lambda inp: model(inp))
    y = jax.block_until_ready(fwd(x))

    assert y.shape == (2, 12, 8, 8), y.shape
    assert bool(jnp.all(jnp.isfinite(y)))

    y_ref = _reference(x, 0.1)
    err = float(jnp.max(jnp.abs(y - y_ref)))
    assert err < 1e-1, f"max abs error vs f32 reference: {err}"

    print("KERNEL_OK")
</pallas_src>

<mosaic_0001>
module attributes {stable_mosaic.version = 11 : i64} {
  func.func @_gaussian_attention_kernel(%arg0: i32, %arg1: i32, %arg2: i32, %arg3: memref<1xf32, #tpu.memory_space<smem>>, %arg4: memref<2x13x64xf32, #tpu.memory_space<vmem>>, %arg5: memref<2x13x64xf32, #tpu.memory_space<vmem>>, %arg6: memref<2x12x64xf32, #tpu.memory_space<vmem>>, %arg7: memref<2x1x64xf32, #tpu.memory_space<vmem>>, %arg8: memref<2x13x64xf32, #tpu.memory_space<vmem>>) attributes {dimension_semantics = [#tpu.dimension_semantics<parallel>, #tpu.dimension_semantics<parallel>, #tpu.dimension_semantics<arbitrary>], iteration_bounds = array<i64: 1, 1, 1>, scalar_prefetch = 0 : i64, scratch_operands = 2 : i64, tpu.core_type = #tpu.core_type<tc>, window_params = [{transform_indices = @transform_0, window_bounds = array<i64: 1>}, {transform_indices = @transform_1, window_bounds = array<i64: 2, 13, 64>}, {transform_indices = @transform_2, window_bounds = array<i64: 2, 13, 64>}, {transform_indices = @transform_3, window_bounds = array<i64: 2, 12, 64>}]} {
    %c0_i32 = arith.constant 0 : i32
    %0 = arith.cmpi eq, %arg2, %c0_i32 : i32
    %1 = arith.extui %0 : i1 to i32
    %c0_i32_0 = arith.constant 0 : i32
    %2 = arith.cmpi ne, %1, %c0_i32_0 : i32
    scf.if %2 {
      %cst_22 = arith.constant 0xFF800000 : f32
      %28 = vector.broadcast %cst_22 : f32 to vector<2x1x64xf32>
      %c0_23 = arith.constant 0 : index
      %c0_24 = arith.constant 0 : index
      %c0_25 = arith.constant 0 : index
      %29 = vector.load %arg7[%c0_23, %c0_24, %c0_25] : memref<2x1x64xf32, #tpu.memory_space<vmem>>, vector<2x1x64xf32>
      tpu.vector_store %arg7[%c0_23, %c0_24, %c0_25], %28 {strides = array<i32>} : memref<2x1x64xf32, #tpu.memory_space<vmem>>, vector<2x1x64xf32>,
      %cst_26 = arith.constant 0.000000e+00 : f32
      %30 = vector.broadcast %cst_26 : f32 to vector<2x13x64xf32>
      %c0_27 = arith.constant 0 : index
      %c0_28 = arith.constant 0 : index
      %c0_29 = arith.constant 0 : index
      %31 = vector.load %arg8[%c0_27, %c0_28, %c0_29] : memref<2x13x64xf32, #tpu.memory_space<vmem>>, vector<2x13x64xf32>
      tpu.vector_store %arg8[%c0_27, %c0_28, %c0_29], %30 {strides = array<i32>} : memref<2x13x64xf32, #tpu.memory_space<vmem>>, vector<2x13x64xf32>,
    } else {
    }
    %c0 = arith.constant 0 : index
    %c0_1 = arith.constant 0 : index
    %c0_2 = arith.constant 0 : index
    %3 = vector.load %arg4[%c0, %c0_1, %c0_2] : memref<2x13x64xf32, #tpu.memory_space<vmem>>, vector<2x13x64xf32>
    %c0_3 = arith.constant 0 : index
    %c0_4 = arith.constant 0 : index
    %c0_5 = arith.constant 0 : index
    %4 = vector.load %arg5[%c0_3, %c0_4, %c0_5] : memref<2x13x64xf32, #tpu.memory_space<vmem>>, vector<2x13x64xf32>
    %5 = arith.truncf %3 : vector<2x13x64xf32> to vector<2x13x64xbf16>
    %6 = arith.truncf %4 : vector<2x13x64xf32> to vector<2x13x64xbf16>
    %cst = arith.constant dense<0.000000e+00> : vector<2x64x64xf32>
    %7 = tpu.matmul %6, %5, %cst {dimension_numbers = #tpu.dot_dimension_numbers<[1], [1], [2], [2], [0, 0, 0, 2, 1, 2], [0], [0]>} : vector<2x13x64xbf16>, vector<2x13x64xbf16>, vector<2x64x64xf32> -> vector<2x64x64xf32>
    %c0_6 = arith.constant 0 : index
    %c0_7 = arith.constant 0 : index
    %c0_8 = arith.constant 0 : index
    %8 = vector.load %arg7[%c0_6, %c0_7, %c0_8] : memref<2x1x64xf32, #tpu.memory_space<vmem>>, vector<2x1x64xf32>
    %cst_9 = arith.constant dense<0xFF800000> : vector<2x64xf32>
    %9 = vector.multi_reduction <maximumf>, %7, %cst_9 [1] : vector<2x64x64xf32> to vector<2x64xf32>
    %10 = vector.shape_cast %9 : vector<2x64xf32> to vector<2x1x64xf32>
    %11 = arith.maximumf %8, %10 : vector<2x1x64xf32>
    %12 = arith.subf %8, %11 : vector<2x1x64xf32>
    %13 = math.exp %12 : vector<2x1x64xf32>
    %14 = vector.broadcast %11 : vector<2x1x64xf32> to vector<2x64x64xf32>
    %15 = arith.subf %7, %14 : vector<2x64x64xf32>
    %16 = arith.truncf %15 : vector<2x64x64xf32> to vector<2x64x64xbf16>
    %17 = math.exp %16 : vector<2x64x64xbf16>
    %cst_10 = arith.constant dense<0.000000e+00> : vector<2x13x64xf32>
    %18 = tpu.matmul %6, %17, %cst_10 {dimension_numbers = #tpu.dot_dimension_numbers<[2], [1], [1], [2], [0, 0, 0, 1, 1, 2], [0], [0]>} : vector<2x13x64xbf16>, vector<2x64x64xbf16>, vector<2x13x64xf32> -> vector<2x13x64xf32>
    %c0_11 = arith.constant 0 : index
    %c0_12 = arith.constant 0 : index
    %c0_13 = arith.constant 0 : index
    %19 = vector.load %arg8[%c0_11, %c0_12, %c0_13] : memref<2x13x64xf32, #tpu.memory_space<vmem>>, vector<2x13x64xf32>
    %20 = vector.broadcast %13 : vector<2x1x64xf32> to vector<2x13x64xf32>
    %21 = arith.mulf %20, %19 : vector<2x13x64xf32>
    %22 = arith.addf %21, %18 : vector<2x13x64xf32>
    %c0_14 = arith.constant 0 : index
    %c0_15 = arith.constant 0 : index
    %c0_16 = arith.constant 0 : index
    %23 = vector.load %arg8[%c0_14, %c0_15, %c0_16] : memref<2x13x64xf32, #tpu.memory_space<vmem>>, vector<2x13x64xf32>
    tpu.vector_store %arg8[%c0_14, %c0_15, %c0_16], %22 {strides = array<i32>} : memref<2x13x64xf32, #tpu.memory_space<vmem>>, vector<2x13x64xf32>,
    %c0_17 = arith.constant 0 : index
    %c0_18 = arith.constant 0 : index
    %c0_19 = arith.constant 0 : index
    %24 = vector.load %arg7[%c0_17, %c0_18, %c0_19] : memref<2x1x64xf32, #tpu.memory_space<vmem>>, vector<2x1x64xf32>
    tpu.vector_store %arg7[%c0_17, %c0_18, %c0_19], %11 {strides = array<i32>} : memref<2x1x64xf32, #tpu.memory_space<vmem>>, vector<2x1x64xf32>,
    %c0_i32_20 = arith.constant 0 : i32
    %25 = arith.cmpi eq, %arg2, %c0_i32_20 : i32
    %26 = arith.extui %25 : i1 to i32
    %c0_i32_21 = arith.constant 0 : i32
    %27 = arith.cmpi ne, %26, %c0_i32_21 : i32
    scf.if %27 {
      %c0_22 = arith.constant 0 : index
      %28 = memref.load %arg3[%c0_22] : memref<1xf32, #tpu.memory_space<smem>>
      %c0_23 = arith.constant 0 : index
      %c0_24 = arith.constant 0 : index
      %c0_25 = arith.constant 0 : index
      %29 = vector.load %arg8[%c0_23, %c0_24, %c0_25] : memref<2x13x64xf32, #tpu.memory_space<vmem>>, vector<2x13x64xf32>
      %30 = vector.extract_strided_slice %29 {offsets = [0, 0, 0], sizes = [2, 12, 64], strides = [1, 1, 1]} : vector<2x13x64xf32> to vector<2x12x64xf32>
      %31 = vector.extract_strided_slice %29 {offsets = [0, 12, 0], sizes = [2, 1, 64], strides = [1, 1, 1]} : vector<2x13x64xf32> to vector<2x1x64xf32>
      %32 = tpu.reciprocal %31 {approx = true} : vector<2x1x64xf32> -> vector<2x1x64xf32>
      %33 = vector.extract_strided_slice %3 {offsets = [0, 0, 0], sizes = [2, 12, 64], strides = [1, 1, 1]} : vector<2x13x64xf32> to vector<2x12x64xf32>
      %34 = vector.broadcast %32 : vector<2x1x64xf32> to vector<2x12x64xf32>
      %35 = arith.mulf %30, %34 : vector<2x12x64xf32>
      %36 = vector.broadcast %28 : f32 to vector<2x12x64xf32>
      %37 = arith.mulf %36, %35 : vector<2x12x64xf32>
      %38 = arith.addf %33, %37 : vector<2x12x64xf32>
      %c0_26 = arith.constant 0 : index
      %c0_27 = arith.constant 0 : index
      %c0_28 = arith.constant 0 : index
      %39 = vector.load %arg6[%c0_26, %c0_27, %c0_28] : memref<2x12x64xf32, #tpu.memory_space<vmem>>, vector<2x12x64xf32>
      tpu.vector_store %arg6[%c0_26, %c0_27, %c0_28], %38 {strides = array<i32>} : memref<2x12x64xf32, #tpu.memory_space<vmem>>, vector<2x12x64xf32>,
    } else {
    }
    return
  }
  func.func @transform_0(%arg0: i32, %arg1: i32, %arg2: i32) -> i32 {
    %c0_i32 = arith.constant 0 : i32
    %c0_i32_0 = arith.constant 0 : i32
    return %c0_i32 : i32
  }
  func.func @transform_1(%arg0: i32, %arg1: i32, %arg2: i32) -> (i32, i32, i32) {
    %c0_i32 = arith.constant 0 : i32
    %c0_i32_0 = arith.constant 0 : i32
    return %arg0, %c0_i32, %arg1 : i32, i32, i32
  }
  func.func @transform_2(%arg0: i32, %arg1: i32, %arg2: i32) -> (i32, i32, i32) {
    %c0_i32 = arith.constant 0 : i32
    %c0_i32_0 = arith.constant 0 : i32
    return %arg0, %c0_i32, %arg2 : i32, i32, i32
  }
  func.func @transform_3(%arg0: i32, %arg1: i32, %arg2: i32) -> (i32, i32, i32) {
    %c0_i32 = arith.constant 0 : i32
    %c0_i32_0 = arith.constant 0 : i32
    return %arg0, %c0_i32, %arg1 : i32, i32, i32
  }
}

</mosaic_0001>

<bundles_post_ra>
// kernel: _lambda_.1
= control target key start
LH: loop header
LB: loop body
LE: loop exit
PB: predicated region body
PF: predicated region fallthrough
CT: control target
= control target key end

     0   :  { %vm85_vm0 = vcmask 1045504   ;;  %vm86_vm1 = vcmask 1046528   ;;  %v554_v12 = vmov 65535   ;;  %vm72_vm2 = vcmask 105472   ;;  %s766_s2 = inlined_call_operand.vmem [shape: f32[2,13,64], index: 2, kind: input, shape index: {}, may-alias: {1,2}]   ;;  %s767_s1 = inlined_call_operand.vmem [shape: f32[2,13,64], index: 1, kind: input, shape index: {}, may-alias: {1,2}]   ;;  %s768_s0 = inlined_call_operand.<no memory space> [shape: f32[1], index: 0, kind: input, shape index: {}]   ;;  %s769_s3 = inlined_call_operand.vmem [shape: f32[2,12,64], index: 3, kind: output, shape index: {}]  }
   0x1   :  { %v33_v0 = vld [vmem:[%s766_s2] sm:$0xff]  ;;  %v34_v1 = vld [vmem:[%s766_s2 + $0x8] sm:$0x1f]  ;;  %v35_v2 = vld [vmem:[%s766_s2 + $0x10] sm:$0xff]  ;;  %v87_v13 = vsel %vm85_vm0, 4294967295, %v554_v12  ;;  %vm20_vm3 = vcmask 516096  }
   0x2   :  { %v36_v3 = vld [vmem:[%s766_s2 + $0x18] sm:$0x1f]  ;;  %v41_v4 = vpack.c.bf16 %v33_v0, %v33_v0  ;;  %v42_v5 = vpack.c.bf16 %v34_v1, %v34_v1  ;;  %v43_v6 = vpack.c.bf16 %v35_v2, %v35_v2  ;;  %v592_v7 = vld [vmem:[%s767_s1] sm:$0xff]  ;;  %v597_v8 = vld [vmem:[%s767_s1 + $0x8] sm:$0x1f]  ;;  %v88_v21 = vsel %vm86_vm1, %v87_v13, 0 }
   0x3   :  { %v44_v9 = vpack.c.bf16 %v36_v3, %v36_v3  ;;  %v37_v10 = vpack.c.bf16 %v592_v7, %v592_v7  ;;  %v38_v11 = vpack.c.bf16 %v597_v8, %v597_v8  ;;  %v612_v25 = vld [vmem:[%s767_s1 + $0x10] sm:$0xff]  ;;  %v617_v26 = vld [vmem:[%s767_s1 + $0x18] sm:$0x1f]  ;;  %v555_v45 = vmov -inf  }
   0x4   :  { %v47_v14 = vunpack.c.l.b16 %v41_v4  ;;  %v48_v15 = vunpack.c.l.b16 %v42_v5  ;;  %v123_v16 = vunpack.c.l.b16 %v43_v6  ;;  %v39_v27 = vpack.c.bf16 %v612_v25, %v612_v25  ;;  %21 = vst.msk [vmem:[#allocation2] sm:$0x1] %vm20_vm3, %v555_v45 }
   0x5   :  { %v124_v17 = vunpack.c.l.b16 %v44_v9  ;;  %v69_v18 = vunpack.c.l.b16 %v37_v10  ;;  %v70_v19 = vunpack.c.l.b16 %v38_v11  ;;  %v40_v28 = vpack.c.bf16 %v617_v26, %v617_v26  ;;  %22 = vst.msk [vmem:[#allocation2 + $0x1] sm:$0x1] %vm20_vm3, %v555_v45 }
   0x6   :  { %v603_v20 = vpack.c.b16 %v48_v15, %v47_v14  ;;  %v145_v29 = vunpack.c.l.b16 %v39_v27  ;;  %vm23_vm4 = vcmask 523264   ;;  %vm25_vm5 = vcmask 520192  }
   0x7   :  { %v605_v22 = vpack.c.b16 %v124_v17, %v123_v16  ;;  %v71_v23 = vpack.c.b16 %v70_v19, %v69_v18  ;;  %v146_v30 = vunpack.c.l.b16 %v40_v28  ;;  %v556_v28 = vmov 0.0  }
   0x8   :  { %24 = vst.msk [vmem:[#allocation3] sm:$0xff] %vm23_vm4, %v556_v28  ;;  %vm481_vm6 = vcmask 519168  }
   0x9   :  { %505 = vxpose.binary.xlu0.c.b16.start.end [1/2] (short) (narrow) %v605_v22, %v603_v20, 64  ;;  %v90_v24 = vand.u32 %v88_v21, %v71_v23  ;;  %v147_v31 = vpack.c.b16 %v146_v30, %v145_v29  ;;  %27 = vst.msk [vmem:[#allocation3 + $0x10] sm:$0xff] %vm23_vm4, %v556_v28 }
   0xa   :  { %26 = vst.msk [vmem:[#allocation3 + $0x8] sm:$0x1f] %vm25_vm5, %v556_v28 }
   0xb   :  { %99 = vmatpush.bf16.msra.mxu0 %v90_v24  ;;  %499 = vmatpush.bf16.msra.mxu2 %v90_v24  ;;  %v161_v32 = vand.u32 %v147_v31, %v88_v21  ;;  %28 = vst.msk [vmem:[#allocation3 + $0x18] sm:$0x1f] %vm25_vm5, %v556_v28 }
   0xd   :  { %170 = vmatpush.bf16.msra.mxu1 %v161_v32  ;;  %500 = vmatpush.bf16.msra.mxu3 %v161_v32 }
  0xb5   :  { %v506_v33 = vpop.trf.xlu0 }
  0xb6   :  { %489 = vmatmul.msk.bf16.vlgmr.msra.gmra.mxu0 %vm72_vm2, %v506_v33 }
  0xbd   :  { %v507_v34 = vpop.trf.xlu0 }
  0xbe   :  { %493 = vmatmul.msk.bf16.vlgmr.msra.gmra.mxu1 %vm72_vm2, %v507_v34 }
  0xc5   :  { %v508_v35 = vpop.trf.xlu0 }
  0xc6   :  { %490 = vmatmul.msk.bf16.gmra.mxu0 %vm72_vm2, %v508_v35 }
  0xcd   :  { %v509_v36 = vpop.trf.xlu0 }
  0xce   :  { %494 = vmatmul.msk.bf16.gmra.mxu1 %vm72_vm2, %v509_v36 }
  0xd5   :  { %v510_v37 = vpop.trf.xlu0 }
  0xd6   :  { %491 = vmatmul.msk.bf16.gmra.mxu0 %vm72_vm2, %v510_v37  ;;  %v687_v37 = vld [vmem:[#allocation2] sm:$0x1] }
  0xdd   :  { %v511_v38 = vpop.trf.xlu0 }
  0xde   :  { %495 = vmatmul.msk.bf16.gmra.mxu1 %vm72_vm2, %v511_v38 }
  0xe5   :  { %v512_v39 = vpop.trf.xlu0 }
  0xe6   :  { %492 = vmatmul.msk.bf16.vlgmr.msra.gmra.mxu2 %vm72_vm2, %v512_v39 }
  0xed   :  { %v513_v40 = vpop.trf.xlu0 }
  0xee   :  { %496 = vmatmul.msk.bf16.vlgmr.msra.gmra.mxu3 %vm72_vm2, %v513_v40 }
 0x133   :  { %v631_v41 = vpop.f32.mrf.mxu0 }
 0x134   :  { %v195_v56 = vsel %vm23_vm4, %v631_v41, -inf }
 0x13b   :  { %v633_v42 = vpop.f32.mrf.mxu1  ;;  %v635_v43 = vpop.f32.mrf.mxu0 }
 0x13c   :  { %v196_v57 = vsel %vm23_vm4, %v635_v43, -inf  ;;  %v216_v12 = vsel %vm23_vm4, %v633_v42, -inf }
 0x143   :  { %v637_v44 = vpop.f32.mrf.mxu1  ;;  %v640_v46 = vpop.f32.mrf.mxu0 }
 0x144   :  { %v197_v54 = vsel %vm23_vm4, %v640_v46, -inf  ;;  %v217_v13 = vsel %vm23_vm4, %v637_v44, -inf }
 0x145   :  { %v198_v60 = vmax.f32 %v195_v56, %v197_v54 }
 0x14b   :  { %v643_v47 = vpop.f32.mrf.mxu1  ;;  %v645_v48 = vpop.f32.mrf.mxu0 }
 0x14c   :  { %v199_v55 = vsel %vm23_vm4, %v645_v48, -inf  ;;  %v218_v9 = vsel %vm23_vm4, %v643_v47, -inf }
 0x14d   :  { %v200_v61 = vmax.f32 %v196_v57, %v199_v55  ;;  %v219_v16 = vmax.f32 %v216_v12, %v218_v9 }
 0x153   :  { %v647_v49 = vpop.f32.mrf.mxu1  ;;  %v649_v50 = vpop.f32.mrf.mxu0 }
 0x154   :  { %v201_v58 = vsel %vm23_vm4, %v649_v50, -inf  ;;  %v220_v10 = vsel %vm23_vm4, %v647_v49, -inf }
 0x155   :  { %v202_v63 = vmax.f32 %v198_v60, %v201_v58  ;;  %v221_v17 = vmax.f32 %v217_v13, %v220_v10 }
 0x15b   :  { %v651_v51 = vpop.f32.mrf.mxu1  ;;  %v113_v53 = vpop.f32.mrf.mxu0 }
 0x15c   :  { %v203_v59 = vsel %vm23_vm4, %v113_v53, -inf  ;;  %v222_v14 = vsel %vm23_vm4, %v651_v51, -inf }
 0x15d   :  { %v204_v0 = vmax.f32 %v200_v61, %v203_v59  ;;  %v223_v21 = vmax.f32 %v219_v16, %v222_v14  ;;  %v700_v61 = vld [vmem:[#allocation2 + $0x1] sm:$0x1] }
 0x163   :  { %v668_v4 = vpop.f32.mrf.mxu1 }
 0x164   :  { %v224_v15 = vsel %vm23_vm4, %v668_v4, -inf }
 0x165   :  { %v225_v23 = vmax.f32 %v221_v17, %v224_v15 }
 0x169   :  { %v116_v52 = vpop.f32.mrf.mxu2 }
 0x16a   :  { %v205_v62 = vsel %vm23_vm4, %v116_v52, -inf }
 0x16b   :  { %v206_v5 = vmax.f32 %v202_v63, %v205_v62 }
 0x171   :  { %v118_v1 = vpop.f32.mrf.mxu2  ;;  %v665_v2 = vpop.f32.mrf.mxu3 }
 0x172   :  { %v207_v3 = vsel %vm23_vm4, %v118_v1, -inf  ;;  %v226_v19 = vsel %vm23_vm4, %v665_v2, -inf }
 0x173   :  { %v208_v6 = vmax.f32 %v204_v0, %v207_v3  ;;  %v227_v31 = vmax.f32 %v223_v21, %v226_v19 }
 0x175   :  { %v209_v11 = vmax.f32 %v206_v5, %v208_v6 }
 0x177   :  { %v210_v18 = vrot.slane %v209_v11, 4 }
 0x179   :  { %v211_v24 = vmax.f32 %v209_v11, %v210_v18  ;;  %v189_v27 = vpop.f32.mrf.mxu3 }
 0x17a   :  { %v228_v29 = vsel %vm23_vm4, %v189_v27, -inf }
 0x17b   :  { %v212_v30 = vrot.slane %v211_v24, 2  ;;  %v229_v32 = vmax.f32 %v225_v23, %v228_v29 }
 0x17d   :  { %v213_v33 = vmax.f32 %v211_v24, %v212_v30  ;;  %v230_v34 = vmax.f32 %v227_v31, %v229_v32 }
 0x17f   :  { %v214_v35 = vrot.slane %v213_v33, 1  ;;  %v231_v36 = vrot.slane %v230_v34, 4 }
 0x181   :  { %v215_v38 = vmax.f32 %v213_v33, %v214_v35  ;;  %v232_v39 = vmax.f32 %v230_v34, %v231_v36 }
 0x183   :  { %v691_v40 = vmax.f32 %v687_v37, %v215_v38  ;;  %v233_v45 = vrot.slane %v232_v39, 2 }
 0x185   :  { %v247_v54 = vperm.slane %v691_v40, 0  ;;  %453 = vst.msk [vmem:[#allocation2] sm:$0x1] %vm20_vm3, %v691_v40  ;;  %v234_v55 = vmax.f32 %v232_v39, %v233_v45  ;;  %v239_v56 = vsub.f32 %v687_v37, %v691_v40 }
 0x187   :  { %v258_v57 = vsub.f32 %v118_v1, %v247_v54  ;;  %v235_v58 = vrot.slane %v234_v55, 1  ;;  %v257_v59 = vsub.f32 %v116_v52, %v247_v54  ;;  %v255_v60 = vsub.f32 %v649_v50, %v247_v54 }
 0x188   :  { %v256_v62 = vsub.f32 %v113_v53, %v247_v54  ;;  %v253_v63 = vsub.f32 %v640_v46, %v247_v54  ;;  %v254_v0 = vsub.f32 %v645_v48, %v247_v54  ;;  %v251_v3 = vsub.f32 %v631_v41, %v247_v54 }
 0x189   :  { %v274_v5 = vpack.c.bf16 %v258_v57, %v258_v57  ;;  %v236_v6 = vmax.f32 %v234_v55, %v235_v58  ;;  %v273_v9 = vpack.c.bf16 %v257_v59, %v257_v59  ;;  %v271_v10 = vpack.c.bf16 %v255_v60, %v255_v60 }
 0x18a   :  { %v272_v11 = vpack.c.bf16 %v256_v62, %v256_v62  ;;  %v269_v12 = vpack.c.bf16 %v253_v63, %v253_v63  ;;  %v270_v1 = vpack.c.bf16 %v254_v0, %v254_v0  ;;  %v252_v52 = vsub.f32 %v635_v43, %v247_v54 }
 0x18b   :  { %v290_v13 = vunpack.c.l.bf16 %v274_v5  ;;  %v707_v50 = vmax.f32 %v700_v61, %v236_v6  ;;  %v289_v53 = vunpack.c.l.bf16 %v273_v9  ;;  %v287_v14 = vunpack.c.l.bf16 %v271_v10 }
 0x18c   :  { %v288_v46 = vunpack.c.l.bf16 %v272_v11  ;;  %v285_v15 = vunpack.c.l.bf16 %v269_v12  ;;  %v286_v48 = vunpack.c.l.bf16 %v270_v1  ;;  %v267_v16 = vpack.c.bf16 %v251_v3, %v251_v3 }
 0x18d   :  { %v313_v41 = vmul.f32 1.442695, %v290_v13  ;;  %v710_v17 = vperm.slane %v707_v50, 0  ;;  %454 = vst.msk [vmem:[#allocation2 + $0x1] sm:$0x1] %vm20_vm3, %v707_v50  ;;  %v268_v18 = vpack.c.bf16 %v252_v52, %v252_v52  ;;  %v240_v43 = vsub.f32 %v700_v61, %v707_v50 }
 0x18e   :  { %v311_v19 = vmul.f32 1.442695, %v289_v53  ;;  %v307_v21 = vmul.f32 1.442695, %v287_v14  ;;  %v309_v23 = vmul.f32 1.442695, %v288_v46  ;;  %v283_v24 = vunpack.c.l.bf16 %v267_v16 }
 0x18f   :  { %514 = vpow2.f32 %v313_v41  ;;  %v266_v28 = vsub.f32 %v189_v27, %v710_v17  ;;  %v303_v29 = vmul.f32 1.442695, %v285_v15  ;;  %v305_v30 = vmul.f32 1.442695, %v286_v48  ;;  %v432_v50 = vld [vmem:[#allocation3 + $0x18] sm:$0x1f] }
 0x190   :  { %516 = vpow2.f32 %v311_v19  ;;  %v265_v31 = vsub.f32 %v665_v2, %v710_v17  ;;  %v284_v32 = vunpack.c.l.bf16 %v268_v18  ;;  %v299_v33 = vmul.f32 1.442695, %v283_v24 }
 0x191   :  { %v282_v34 = vpack.c.bf16 %v266_v28, %v266_v28  ;;  %518 = vpow2.f32 %v307_v21  ;;  %v263_v35 = vsub.f32 %v651_v51, %v710_v17  ;;  %v264_v36 = vsub.f32 %v668_v4, %v710_v17 }
 0x192   :  { %520 = vpow2.f32 %v309_v23  ;;  %v281_v38 = vpack.c.bf16 %v265_v31, %v265_v31  ;;  %v301_v39 = vmul.f32 1.442695, %v284_v32  ;;  %v261_v27 = vsub.f32 %v643_v47, %v710_v17 }
 0x193   :  { %v298_v45 = vunpack.c.l.bf16 %v282_v34  ;;  %522 = vpow2.f32 %v303_v29  ;;  %v279_v54 = vpack.c.bf16 %v263_v35, %v263_v35  ;;  %v280_v2 = vpack.c.bf16 %v264_v36, %v264_v36 }
 0x194   :  { %524 = vpow2.f32 %v305_v30  ;;  %v297_v55 = vunpack.c.l.bf16 %v281_v38  ;;  %v262_v57 = vsub.f32 %v647_v49, %v710_v17  ;;  %v277_v58 = vpack.c.bf16 %v261_v27, %v261_v27 }
 0x195   :  { %v515_v51 = vpop.eup %514  ;;  %v329_v59 = vmul.f32 1.442695, %v298_v45  ;;  %526 = vpow2.f32 %v299_v33  ;;  %v295_v4 = vunpack.c.l.bf16 %v279_v54  ;;  %v296_v60 = vunpack.c.l.bf16 %v280_v2 }
 0x196   :  { %v517_v62 = vpop.eup %516  ;;  %v338_v63 = vpack.c.bf16 %v515_v51, %v515_v51  ;;  %v327_v0 = vmul.f32 1.442695, %v297_v55  ;;  %528 = vpow2.f32 %v301_v39  ;;  %v278_v47 = vpack.c.bf16 %v262_v57, %v262_v57 }
 0x197   :  { %v519_v3 = vpop.eup %518  ;;  %530 = vpow2.f32 %v329_v59  ;;  %v337_v5 = vpack.c.bf16 %v517_v62, %v517_v62  ;;  %v323_v6 = vmul.f32 1.442695, %v295_v4  ;;  %v325_v9 = vmul.f32 1.442695, %v296_v60 }
 0x198   :  { %v521_v10 = vpop.eup %520  ;;  %v362_v11 = vunpack.c.l.b16 %v338_v63  ;;  %v335_v12 = vpack.c.bf16 %v519_v3, %v519_v3  ;;  %532 = vpow2.f32 %v327_v0  ;;  %v293_v49 = vunpack.c.l.bf16 %v277_v58 }
 0x199   :  { %v523_v1 = vpop.eup %522  ;;  %v361_v52 = vunpack.c.l.b16 %v337_v5  ;;  %v336_v13 = vpack.c.bf16 %v521_v10, %v521_v10  ;;  %534 = vpow2.f32 %v323_v6  ;;  %v294_v53 = vunpack.c.l.bf16 %v278_v47 }
 0x19a   :  { %v525_v14 = vpop.eup %524  ;;  %v359_v46 = vunpack.c.l.b16 %v335_v12  ;;  %v333_v15 = vpack.c.bf16 %v523_v1, %v523_v1  ;;  %536 = vpow2.f32 %v325_v9  ;;  %v319_v48 = vmul.f32 1.442695, %v293_v49 }
 0x19b   :  { %v527_v16 = vpop.eup %526  ;;  %v366_v41 = vpack.c.b16 %v362_v11, %v361_v52  ;;  %v360_v18 = vunpack.c.l.b16 %v336_v13  ;;  %v334_v19 = vpack.c.bf16 %v525_v14, %v525_v14  ;;  %v321_v21 = vmul.f32 1.442695, %v294_v53 }
 0x19c   :  { %v529_v23 = vpop.eup %528  ;;  %538 = vpow2.f32 %v319_v48  ;;  %v259_v24 = vsub.f32 %v633_v42, %v710_v17  ;;  %v357_v29 = vunpack.c.l.b16 %v333_v15  ;;  %v331_v31 = vpack.c.bf16 %v527_v16, %v527_v16 }
 0x19d   :  { %v531_v28 = vpop.eup %530  ;;  %378 = vmatpush.bf16.msrb.mxu2 %v366_v41  ;;  %v358_v30 = vunpack.c.l.b16 %v334_v19  ;;  %540 = vpow2.f32 %v321_v21  ;;  %v332_v34 = vpack.c.bf16 %v529_v23, %v529_v23  ;;  %v260_v35 = vsub.f32 %v637_v44, %v710_v17 }
 0x19e   :  { %v533_v32 = vpop.eup %532  ;;  %v346_v33 = vpack.c.bf16 %v531_v28, %v531_v28  ;;  %v275_v36 = vpack.c.bf16 %v259_v24, %v259_v24  ;;  %v365_v39 = vpack.c.b16 %v360_v18, %v359_v46  ;;  %v355_v58 = vunpack.c.l.b16 %v331_v31  ;;  %v429_v18 = vld [vmem:[#allocation3] sm:$0xff] }
 0x19f   :  { %v535_v38 = vpop.eup %534  ;;  %v345_v27 = vpack.c.bf16 %v533_v32, %v533_v32  ;;  %v276_v42 = vpack.c.bf16 %v260_v35, %v260_v35  ;;  %v364_v4 = vpack.c.b16 %v358_v30, %v357_v29  ;;  %v356_v60 = vunpack.c.l.b16 %v332_v34  ;;  %v431_v29 = vld [vmem:[#allocation3 + $0x10] sm:$0xff] }
 0x1a0   :  { %v537_v45 = vpop.eup %536  ;;  %v403_v54 = vunpack.c.l.b16 %v346_v33  ;;  %v343_v2 = vpack.c.bf16 %v535_v38, %v535_v38  ;;  %v291_v55 = vunpack.c.l.bf16 %v275_v36  ;;  %v241_v48 = vmul.f32 1.442695, %v239_v56 }
 0x1a1   :  { %379 = vmatpush.bf16.msrb.mxu2 %v365_v39  ;;  %v402_v57 = vunpack.c.l.b16 %v345_v27  ;;  %v344_v51 = vpack.c.bf16 %v537_v45, %v537_v45  ;;  %v292_v62 = vunpack.c.l.bf16 %v276_v42  ;;  %v363_v9 = vpack.c.b16 %v356_v60, %v355_v58 }
 0x1a2   :  { %v539_v59 = vpop.eup %538  ;;  %v315_v63 = vmul.f32 1.442695, %v291_v55  ;;  %v400_v17 = vunpack.c.l.b16 %v343_v2  ;;  %v243_v41 = vmul.f32 1.442695, %v240_v43  ;;  %v471_v39 = vstv %s768_s0 }
 0x1a3   :  { %v541_v0 = vpop.eup %540  ;;  %v407_v44 = vpack.c.b16 %v403_v54, %v402_v57  ;;  %v401_v47 = vunpack.c.l.b16 %v344_v51  ;;  %v341_v3 = vpack.c.bf16 %v539_v59, %v539_v59  ;;  %v317_v6 = vmul.f32 1.442695, %v292_v62 }
 0x1a4   :  { %v342_v5 = vpack.c.bf16 %v541_v0, %v541_v0  ;;  %542 = vpow2.f32 %v315_v63 }
 0x1a5   :  { %380 = vmatpush.bf16.msrb.mxu2 %v364_v4  ;;  %419 = vmatpush.bf16.msrb.mxu3 %v407_v44  ;;  %544 = vpow2.f32 %v317_v6  ;;  %v406_v10 = vpack.c.b16 %v401_v47, %v400_v17  ;;  %v398_v11 = vunpack.c.l.b16 %v341_v3 }
 0x1a6   :  { %v399_v12 = vunpack.c.l.b16 %v342_v5  ;;  %546 = vpow2.f32 %v241_v48 }
 0x1a7   :  { %548 = vpow2.f32 %v243_v41 }
 0x1a8   :  { %v405_v1 = vpack.c.b16 %v399_v12, %v398_v11 }
 0x1a9   :  { %381 = vmatpush.bf16.msrb.mxu2 %v363_v9  ;;  %420 = vmatpush.bf16.msrb.mxu3 %v406_v10 }
 0x1aa   :  { %v543_v49 = vpop.eup %542 }
 0x1ab   :  { %v339_v52 = vpack.c.bf16 %v543_v49, %v543_v49  ;;  %v545_v13 = vpop.eup %544 }
 0x1ac   :  { %497 = vmatmul.msk.bf16.vlgmr.msrb.gmra.mxu2 %vm23_vm4, %v603_v20  ;;  %v340_v53 = vpack.c.bf16 %v545_v13, %v545_v13  ;;  %v547_v16 = vpop.eup %546 }
 0x1ad   :  { %421 = vmatpush.bf16.msrb.mxu3 %v405_v1  ;;  %v396_v14 = vunpack.c.l.b16 %v339_v52  ;;  %v435_v20 = vperm.slane %v547_v16, 0  ;;  %v549_v24 = vpop.eup %548 }
 0x1ae   :  { %v397_v46 = vunpack.c.l.b16 %v340_v53  ;;  %v436_v28 = vperm.slane %v549_v24, 0 }
 0x1af   :  { %v439_v19 = vmul.f32 %v435_v20, %v429_v18 }
 0x1b0   :  { %v404_v15 = vpack.c.b16 %v397_v46, %v396_v14  ;;  %v441_v30 = vmul.f32 %v436_v28, %v431_v29  ;;  %v442_v43 = vmul.f32 %v436_v28, %v432_v50 }
 0x1b2   :  { %422 = vmatpush.bf16.msrb.mxu3 %v404_v15 }
 0x1b5   :  { %498 = vmatmul.msk.bf16.vlgmr.msrb.gmra.mxu3 %vm23_vm4, %v605_v22  ;;  %v430_v22 = vld [vmem:[#allocation3 + $0x8] sm:$0x1f] }
 0x1b6   :  { %v440_v37 = vmul.f32 %v435_v20, %v430_v22 }
 0x22f   :  { %v383_v21 = vpop.f32.mrf.mxu2 }
 0x230   :  { %v443_v23 = vadd.f32 %v439_v19, %v383_v21 }
 0x232   :  { %447 = vst.msk [vmem:[#allocation3] sm:$0xff] %vm23_vm4, %v443_v23 }
 0x237   :  { %v385_v40 = vpop.f32.mrf.mxu2 }
 0x238   :  { %v444_v56 = vadd.f32 %v440_v37, %v385_v40  ;;  %v424_v31 = vpop.f32.mrf.mxu3 }
 0x239   :  { %v445_v61 = vadd.f32 %v441_v30, %v424_v31  ;;  %v459_v38 = vld [vmem:[#allocation3] sm:$0xff] }
 0x23a   :  { %449 = vst.msk [vmem:[#allocation3 + $0x8] sm:$0x1f] %vm25_vm5, %v444_v56 }
 0x23b   :  { %450 = vst.msk [vmem:[#allocation3 + $0x10] sm:$0xff] %vm23_vm4, %v445_v61 }
 0x240   :  { %v426_v33 = vpop.f32.mrf.mxu3 }
 0x241   :  { %v460_v32 = vld [vmem:[#allocation3 + $0x8] sm:$0x1f]  ;;  %v446_v34 = vadd.f32 %v442_v43, %v426_v33 }
 0x242   :  { %550 = vrcp.f32 %v460_v32  ;;  %v461_v59 = vld [vmem:[#allocation3 + $0x10] sm:$0xff] }
 0x243   :  { %451 = vst.msk [vmem:[#allocation3 + $0x18] sm:$0x1f] %vm25_vm5, %v446_v34 }
 0x248   :  { %v551_v35 = vpop.eup %550 }
 0x249   :  { %v465_v36 = vperm.slane %v551_v35, 4 }
 0x24a   :  { %v462_v54 = vld [vmem:[#allocation3 + $0x18] sm:$0x1f] }
 0x24b   :  { %v467_v27 = vmul.f32 %v465_v36, %v459_v38  ;;  %v468_v45 = vmul.f32 %v465_v36, %v460_v32  ;;  %552 = vrcp.f32 %v462_v54 }
 0x24d   :  { %v472_v2 = vmul.f32 %v471_v39, %v467_v27  ;;  %v473_v42 = vmul.f32 %v471_v39, %v468_v45 }
 0x24f   :  { %v476_v55 = vadd.f32 %v472_v2, %v592_v7  ;;  %v477_v57 = vadd.f32 %v473_v42, %v597_v8 }
 0x251   :  { %480 = vst.msk [vmem:[%s769_s3] sm:$0xff] %vm23_vm4, %v476_v55  ;;  %v553_v58 = vpop.eup %552 }
 0x252   :  { %482 = vst.msk [vmem:[%s769_s3 + $0x8] sm:$0xf] %vm481_vm6, %v477_v57  ;;  %v466_v51 = vperm.slane %v553_v58, 4 }
 0x254   :  { %v469_v4 = vmul.f32 %v466_v51, %v461_v59  ;;  %v470_v60 = vmul.f32 %v466_v51, %v462_v54 }
 0x256   :  { %v474_v62 = vmul.f32 %v471_v39, %v469_v4  ;;  %v475_v63 = vmul.f32 %v471_v39, %v470_v60 }
 0x258   :  { %v478_v7 = vadd.f32 %v474_v62, %v612_v25  ;;  %v479_v8 = vadd.f32 %v475_v63, %v617_v26 }
 0x25a   :  { %483 = vst.msk [vmem:[%s769_s3 + $0x10] sm:$0xff] %vm23_vm4, %v478_v7 }
 0x25b   :  { %484 = vst.msk [vmem:[%s769_s3 + $0x18] sm:$0xf] %vm481_vm6, %v479_v8 }

</bundles_post_ra>
